<compile_context>
chip_gen: v5e
topology: v5e:2x2
jax: 0.10.0
libtpu: 0.0.40
codegen_flags: <defaults>
</compile_context>

<pallas_src>
import functools

import jax
import jax.numpy as jnp
from jax.experimental import pallas as pl
from jax.experimental.pallas import tpu as pltpu

LANE = 128
SUBLANE = 8


def _round_up(n, m):
    return ((n + m - 1) // m) * m


# --------------------------------------------------------------------------
# Kernel
# --------------------------------------------------------------------------
def actor_kernel(x_ref, w1_ref, b1_ref, w2_ref, b2_ref, wh_ref, bh_ref,
                 out_ref, *, d_out):
    """One batch tile: two hidden layers + fused (mu|sigma) head, one store."""
    x = x_ref[...]

    # layer 1: Linear + ReLU  (MXU matmul, f32 accumulate; elementwise in f32)
    h1 = jnp.dot(x, w1_ref[...], preferred_element_type=jnp.float32)
    h1 = jnp.maximum(h1 + b1_ref[...], 0.0)

    # layer 2: Linear + ReLU
    h2 = jnp.dot(h1.astype(w2_ref.dtype), w2_ref[...],
                 preferred_element_type=jnp.float32)
    h2 = jnp.maximum(h2 + b2_ref[...], 0.0)

    # fused head: lanes [0, d_out) = mu logits, [d_out, 2*d_out) = sigma logits,
    # remaining lanes are zero padding (discarded by the wrapper slice).
    z = jnp.dot(h2.astype(wh_ref.dtype), wh_ref[...],
                preferred_element_type=jnp.float32)
    z = z + bh_ref[...]

    # sigmoid via tanh -> EUP slot (cheaper than a VPU divide)
    mu = 0.5 * (jnp.tanh(0.5 * z) + 1.0)
    # numerically stable softplus: max(z, 0) + log1p(exp(-|z|))
    sigma = jnp.maximum(z, 0.0) + jnp.log1p(jnp.exp(-jnp.abs(z)))

    lane = jax.lax.broadcasted_iota(jnp.int32, z.shape, dimension=1)
    out_ref[...] = jnp.where(lane < d_out, mu, sigma).astype(out_ref.dtype)


# --------------------------------------------------------------------------
# Parameter packing (head fusion BEFORE padding; no K-dim pad for x/W1 rows)
# --------------------------------------------------------------------------
def pack_actor_params(params, compute_dtype=jnp.float32):
    w1, b1 = params["w1"], params["b1"]
    w2, b2 = params["w2"], params["b2"]
    wmu, bmu = params["wmu"], params["bmu"]
    wsg, bsg = params["wsg"], params["bsg"]

    d_in, h1 = w1.shape
    _, h2 = w2.shape
    _, d_out = wmu.shape

    h1_p = _round_up(h1, LANE)
    h2_p = _round_up(h2, LANE)
    out_w = _round_up(2 * d_out, LANE)   # fused-head width (128 for d_out<=64)

    def pad2(a, rows, cols):
        return jnp.pad(a, ((0, rows - a.shape[0]), (0, cols - a.shape[1])))

    # fuse heads first, then pad the fused matrix once
    wh = jnp.concatenate([wmu, wsg], axis=1)                       # [h2, 2*d_out]
    bh = jnp.concatenate([bmu.reshape(1, -1), bsg.reshape(1, -1)], axis=1)

    packed = {
        # W1 rows stay at d_in (no contraction-dim padding); cols lane-padded.
        "w1": pad2(w1, d_in, h1_p).astype(compute_dtype),
        "b1": pad2(b1.reshape(1, -1), 1, h1_p).astype(jnp.float32),
        "w2": pad2(w2, h1_p, h2_p).astype(compute_dtype),
        "b2": pad2(b2.reshape(1, -1), 1, h2_p).astype(jnp.float32),
        "wh": pad2(wh, h2_p, out_w).astype(compute_dtype),
        "bh": pad2(bh, 1, out_w).astype(jnp.float32),
    }
    meta = {"d_in": d_in, "d_out": d_out,
            "h1_p": h1_p, "h2_p": h2_p, "out_w": out_w}
    return packed, meta


# --------------------------------------------------------------------------
# Forward wrapper
# --------------------------------------------------------------------------
def actor_forward(x, packed, meta, *, tile_b_max=1024, compute_dtype=jnp.float32):
    """x: [B, input_size] -> (mu, sigma), each [B, output_size] float32."""
    B = x.shape[0]
    d_in, d_out = meta["d_in"], meta["d_out"]
    h1_p, h2_p, out_w = meta["h1_p"], meta["h2_p"], meta["out_w"]

    # Batch tiling: minimize padding, amortize per-step overhead, and (for v7x
    # megacore) give both TensorCores work whenever B is large enough for >=2
    # sublane-aligned tiles.
    n_tiles = pl.cdiv(B, tile_b_max)
    if B >= 2 * SUBLANE:
        n_tiles = max(n_tiles, 2)
    tile_b = _round_up(pl.cdiv(B, n_tiles), SUBLANE)
    b_pad = _round_up(B, tile_b)

    # Only the batch dim is padded; feature (contraction) dim stays at d_in.
    x_p = jnp.pad(x, ((0, b_pad - B), (0, 0))).astype(compute_dtype)

    kernel = functools.partial(actor_kernel, d_out=d_out)
    const_map = lambda i: (0, 0)          # weights/biases resident across batch steps

    out = pl.pallas_call(
        kernel,
        out_shape=jax.ShapeDtypeStruct((b_pad, out_w), jnp.float32),
        grid_spec=pltpu.PrefetchScalarGridSpec(
            num_scalar_prefetch=0,
            grid=(b_pad // tile_b,),
            in_specs=[
                pl.BlockSpec((tile_b, d_in), lambda i: (i, 0)),   # x tile (full d_in)
                pl.BlockSpec((d_in, h1_p), const_map),            # W1
                pl.BlockSpec((1, h1_p), const_map),               # b1
                pl.BlockSpec((h1_p, h2_p), const_map),            # W2
                pl.BlockSpec((1, h2_p), const_map),               # b2
                pl.BlockSpec((h2_p, out_w), const_map),           # fused head W
                pl.BlockSpec((1, out_w), const_map),              # fused head b
            ],
            out_specs=pl.BlockSpec((tile_b, out_w), lambda i: (i, 0)),
        ),
        compiler_params=pltpu.CompilerParams(
            dimension_semantics=("parallel",),
            vmem_limit_bytes=32 * 1024 * 1024),   # sized for v7x (64 MiB/TC)
    )(x_p, packed["w1"], packed["b1"], packed["w2"], packed["b2"],
      packed["wh"], packed["bh"])

    mu = out[:B, :d_out]
    sigma = out[:B, d_out:2 * d_out]
    return mu, sigma


# --------------------------------------------------------------------------
# Init + pure-JAX reference
# --------------------------------------------------------------------------
def init_actor_params(key, input_size, hidden_size1, hidden_size2, output_size):
    """PyTorch-Linear-style init; weights stored as [in_features, out_features]."""
    def linear_init(k, fan_in, fan_out):
        kw, kb = jax.random.split(k)
        bound = 1.0 / jnp.sqrt(fan_in)
        w = jax.random.uniform(kw, (fan_in, fan_out), jnp.float32, -bound, bound)
        b = jax.random.uniform(kb, (1, fan_out), jnp.float32, -bound, bound)
        return w, b

    k1, k2, k3, k4 = jax.random.split(key, 4)
    w1, b1 = linear_init(k1, input_size, hidden_size1)
    w2, b2 = linear_init(k2, hidden_size1, hidden_size2)
    wmu, bmu = linear_init(k3, hidden_size2, output_size)
    wsg, bsg = linear_init(k4, hidden_size2, output_size)
    return {"w1": w1, "b1": b1, "w2": w2, "b2": b2,
            "wmu": wmu, "bmu": bmu, "wsg": wsg, "bsg": bsg}


def actor_forward_ref(x, p):
    h1 = jax.nn.relu(x @ p["w1"] + p["b1"])
    h2 = jax.nn.relu(h1 @ p["w2"] + p["b2"])
    mu = jax.nn.sigmoid(h2 @ p["wmu"] + p["bmu"])
    sigma = jax.nn.softplus(h2 @ p["wsg"] + p["bsg"])
    return mu, sigma


# --------------------------------------------------------------------------
if __name__ == "__main__":
    batch = 8
    input_size = 24
    hidden_size1 = 64
    hidden_size2 = 32
    output_size = 4

    key = jax.random.PRNGKey(0)
    kx, kp = jax.random.split(key)
    x = jax.random.normal(kx, (batch, input_size), jnp.float32)
    params = init_actor_params(kp, input_size, hidden_size1, hidden_size2,
                               output_size)

    # f32 operands for exact reference comparison; pass
    # compute_dtype=jnp.bfloat16 on v6e/v7x to halve operand HBM traffic
    # (relax the allclose tolerances if you do).
    packed, meta = pack_actor_params(params, compute_dtype=jnp.float32)
    mu, sigma = actor_forward(x, packed, meta, compute_dtype=jnp.float32)
    mu, sigma = jax.block_until_ready((mu, sigma))

    mu_ref, sigma_ref = actor_forward_ref(x, params)
    assert mu.shape == (batch, output_size) and sigma.shape == (batch, output_size)
    assert jnp.allclose(mu, mu_ref, atol=1e-5, rtol=1e-5)
    assert jnp.allclose(sigma, sigma_ref, atol=1e-5, rtol=1e-5)

    print("KERNEL_OK")
</pallas_src>

<mosaic_0001>
module attributes {stable_mosaic.version = 11 : i64} {
  func.func @actor_kernel(%arg0: i32, %arg1: memref<8x24xf32, #tpu.memory_space<vmem>>, %arg2: memref<24x128xf32, #tpu.memory_space<vmem>>, %arg3: memref<1x128xf32, #tpu.memory_space<vmem>>, %arg4: memref<128x128xf32, #tpu.memory_space<vmem>>, %arg5: memref<1x128xf32, #tpu.memory_space<vmem>>, %arg6: memref<128x128xf32, #tpu.memory_space<vmem>>, %arg7: memref<1x128xf32, #tpu.memory_space<vmem>>, %arg8: memref<8x128xf32, #tpu.memory_space<vmem>>) attributes {dimension_semantics = [#tpu.dimension_semantics<parallel>], iteration_bounds = array<i64: 1>, scalar_prefetch = 0 : i64, scratch_operands = 0 : i64, tpu.core_type = #tpu.core_type<tc>, window_params = [{transform_indices = @transform_0, window_bounds = array<i64: 8, 24>}, {pipeline_mode = #tpu.pipeline_mode<synchronous>, transform_indices = @transform_1, window_bounds = array<i64: 24, 128>}, {pipeline_mode = #tpu.pipeline_mode<synchronous>, transform_indices = @transform_2, window_bounds = array<i64: 1, 128>}, {pipeline_mode = #tpu.pipeline_mode<synchronous>, transform_indices = @transform_3, window_bounds = array<i64: 128, 128>}, {pipeline_mode = #tpu.pipeline_mode<synchronous>, transform_indices = @transform_4, window_bounds = array<i64: 1, 128>}, {pipeline_mode = #tpu.pipeline_mode<synchronous>, transform_indices = @transform_5, window_bounds = array<i64: 128, 128>}, {pipeline_mode = #tpu.pipeline_mode<synchronous>, transform_indices = @transform_6, window_bounds = array<i64: 1, 128>}, {transform_indices = @transform_7, window_bounds = array<i64: 8, 128>}]} {
    %c0 = arith.constant 0 : index
    %c0_0 = arith.constant 0 : index
    %0 = vector.load %arg1[%c0, %c0_0] : memref<8x24xf32, #tpu.memory_space<vmem>>, vector<8x24xf32>
    %c0_1 = arith.constant 0 : index
    %c0_2 = arith.constant 0 : index
    %1 = vector.load %arg2[%c0_1, %c0_2] : memref<24x128xf32, #tpu.memory_space<vmem>>, vector<24x128xf32>
    %cst = arith.constant dense<0.000000e+00> : vector<8x128xf32>
    %2 = tpu.matmul %0, %1, %cst {dimension_numbers = #tpu.dot_dimension_numbers<[1], [0], [0], [1], [0, 0, 1, 1], [], []>} : vector<8x24xf32>, vector<24x128xf32>, vector<8x128xf32> -> vector<8x128xf32>
    %c0_3 = arith.constant 0 : index
    %c0_4 = arith.constant 0 : index
    %3 = vector.load %arg3[%c0_3, %c0_4] : memref<1x128xf32, #tpu.memory_space<vmem>>, vector<1x128xf32>
    %4 = vector.broadcast %3 : vector<1x128xf32> to vector<8x128xf32>
    %5 = arith.addf %2, %4 : vector<8x128xf32>
    %cst_5 = arith.constant 0.000000e+00 : f32
    %6 = vector.broadcast %cst_5 : f32 to vector<8x128xf32>
    %7 = arith.maximumf %5, %6 : vector<8x128xf32>
    %c0_6 = arith.constant 0 : index
    %c0_7 = arith.constant 0 : index
    %8 = vector.load %arg4[%c0_6, %c0_7] : memref<128x128xf32, #tpu.memory_space<vmem>>, vector<128x128xf32>
    %cst_8 = arith.constant dense<0.000000e+00> : vector<8x128xf32>
    %9 = tpu.matmul %7, %8, %cst_8 {dimension_numbers = #tpu.dot_dimension_numbers<[1], [0], [0], [1], [0, 0, 1, 1], [], []>} : vector<8x128xf32>, vector<128x128xf32>, vector<8x128xf32> -> vector<8x128xf32>
    %c0_9 = arith.constant 0 : index
    %c0_10 = arith.constant 0 : index
    %10 = vector.load %arg5[%c0_9, %c0_10] : memref<1x128xf32, #tpu.memory_space<vmem>>, vector<1x128xf32>
    %11 = vector.broadcast %10 : vector<1x128xf32> to vector<8x128xf32>
    %12 = arith.addf %9, %11 : vector<8x128xf32>
    %cst_11 = arith.constant 0.000000e+00 : f32
    %13 = vector.broadcast %cst_11 : f32 to vector<8x128xf32>
    %14 = arith.maximumf %12, %13 : vector<8x128xf32>
    %c0_12 = arith.constant 0 : index
    %c0_13 = arith.constant 0 : index
    %15 = vector.load %arg6[%c0_12, %c0_13] : memref<128x128xf32, #tpu.memory_space<vmem>>, vector<128x128xf32>
    %cst_14 = arith.constant dense<0.000000e+00> : vector<8x128xf32>
    %16 = tpu.matmul %14, %15, %cst_14 {dimension_numbers = #tpu.dot_dimension_numbers<[1], [0], [0], [1], [0, 0, 1, 1], [], []>} : vector<8x128xf32>, vector<128x128xf32>, vector<8x128xf32> -> vector<8x128xf32>
    %c0_15 = arith.constant 0 : index
    %c0_16 = arith.constant 0 : index
    %17 = vector.load %arg7[%c0_15, %c0_16] : memref<1x128xf32, #tpu.memory_space<vmem>>, vector<1x128xf32>
    %18 = vector.broadcast %17 : vector<1x128xf32> to vector<8x128xf32>
    %19 = arith.addf %16, %18 : vector<8x128xf32>
    %cst_17 = arith.constant 5.000000e-01 : f32
    %20 = vector.broadcast %cst_17 : f32 to vector<8x128xf32>
    %21 = arith.mulf %20, %19 : vector<8x128xf32>
    %22 = math.tanh %21 : vector<8x128xf32>
    %cst_18 = arith.constant 1.000000e+00 : f32
    %23 = vector.broadcast %cst_18 : f32 to vector<8x128xf32>
    %24 = arith.addf %22, %23 : vector<8x128xf32>
    %cst_19 = arith.constant 5.000000e-01 : f32
    %25 = vector.broadcast %cst_19 : f32 to vector<8x128xf32>
    %26 = arith.mulf %25, %24 : vector<8x128xf32>
    %cst_20 = arith.constant 0.000000e+00 : f32
    %27 = vector.broadcast %cst_20 : f32 to vector<8x128xf32>
    %28 = arith.maximumf %19, %27 : vector<8x128xf32>
    %29 = math.absf %19 : vector<8x128xf32>
    %cst_21 = arith.constant 0.000000e+00 : f32
    %30 = vector.broadcast %cst_21 : f32 to vector<8x128xf32>
    %31 = arith.subf %30, %29 : vector<8x128xf32>
    %32 = math.exp %31 : vector<8x128xf32>
    %33 = math.log1p %32 : vector<8x128xf32>
    %34 = arith.addf %28, %33 : vector<8x128xf32>
    %35 = tpu.iota {dimensions = array<i32: 1>} : vector<8x128xi32>
    %c4_i32 = arith.constant 4 : i32
    %36 = vector.broadcast %c4_i32 : i32 to vector<8x128xi32>
    %37 = arith.cmpi slt, %35, %36 : vector<8x128xi32>
    %38 = arith.select %37, %26, %34 : vector<8x128xi1>, vector<8x128xf32>
    %c0_22 = arith.constant 0 : index
    %c0_23 = arith.constant 0 : index
    %39 = vector.load %arg8[%c0_22, %c0_23] : memref<8x128xf32, #tpu.memory_space<vmem>>, vector<8x128xf32>
    tpu.vector_store %arg8[%c0_22, %c0_23], %38 {strides = array<i32>} : memref<8x128xf32, #tpu.memory_space<vmem>>, vector<8x128xf32>,
    return
  }
  func.func @transform_0(%arg0: i32) -> (i32, i32) {
    %c0_i32 = arith.constant 0 : i32
    %c0_i32_0 = arith.constant 0 : i32
    return %arg0, %c0_i32 : i32, i32
  }
  func.func @transform_1(%arg0: i32) -> (i32, i32) {
    %c0_i32 = arith.constant 0 : i32
    %c0_i32_0 = arith.constant 0 : i32
    %c0_i32_1 = arith.constant 0 : i32
    return %c0_i32, %c0_i32_0 : i32, i32
  }
  func.func @transform_2(%arg0: i32) -> (i32, i32) {
    %c0_i32 = arith.constant 0 : i32
    %c0_i32_0 = arith.constant 0 : i32
    %c0_i32_1 = arith.constant 0 : i32
    return %c0_i32, %c0_i32_0 : i32, i32
  }
  func.func @transform_3(%arg0: i32) -> (i32, i32) {
    %c0_i32 = arith.constant 0 : i32
    %c0_i32_0 = arith.constant 0 : i32
    %c0_i32_1 = arith.constant 0 : i32
    return %c0_i32, %c0_i32_0 : i32, i32
  }
  func.func @transform_4(%arg0: i32) -> (i32, i32) {
    %c0_i32 = arith.constant 0 : i32
    %c0_i32_0 = arith.constant 0 : i32
    %c0_i32_1 = arith.constant 0 : i32
    return %c0_i32, %c0_i32_0 : i32, i32
  }
  func.func @transform_5(%arg0: i32) -> (i32, i32) {
    %c0_i32 = arith.constant 0 : i32
    %c0_i32_0 = arith.constant 0 : i32
    %c0_i32_1 = arith.constant 0 : i32
    return %c0_i32, %c0_i32_0 : i32, i32
  }
  func.func @transform_6(%arg0: i32) -> (i32, i32) {
    %c0_i32 = arith.constant 0 : i32
    %c0_i32_0 = arith.constant 0 : i32
    %c0_i32_1 = arith.constant 0 : i32
    return %c0_i32, %c0_i32_0 : i32, i32
  }
  func.func @transform_7(%arg0: i32) -> (i32, i32) {
    %c0_i32 = arith.constant 0 : i32
    %c0_i32_0 = arith.constant 0 : i32
    return %arg0, %c0_i32 : i32, i32
  }
}

</mosaic_0001>

<bundles_post_ra>
// kernel: tpu_custom_call.1
= control target key start
LH: loop header
LB: loop body
LE: loop exit
PB: predicated region body
PF: predicated region fallthrough
CT: control target
= control target key end

     0   :  { %12 = vsyncpa [#allocation3], 0  ;;  %s461_s0 = inlined_call_operand.hbm [shape: f32[8,24], index: 0, kind: input, shape index: {}]   ;;  %s462_s1 = inlined_call_operand.hbm [shape: f32[24,128], index: 1, kind: input, shape index: {}]   ;;  %s463_s2 = inlined_call_operand.vmem [shape: f32[1,128], index: 2, kind: input, shape index: {}]   ;;  %s464_s3 = inlined_call_operand.hbm [shape: f32[128,128], index: 3, kind: input, shape index: {}]   ;;  %s465_s4 = inlined_call_operand.vmem [shape: f32[1,128], index: 4, kind: input, shape index: {}]   ;;  %s466_s5 = inlined_call_operand.hbm [shape: f32[128,128], index: 5, kind: input, shape index: {}]   ;;  %s467_s6 = inlined_call_operand.vmem [shape: f32[1,128], index: 6, kind: input, shape index: {}]   ;;  %s468_s7 = inlined_call_operand.hbm [shape: f32[8,128], index: 7, kind: output, shape index: {}]  }
   0x1   :  { %13 = vsyncpa [#allocation6], 0 }
   0x2   :  { %14 = vsyncpa [#allocation9], 0  ;;  %s31_s26 = sshll.u32 %s462_s1, 4  ;;  %s32_s26 = int_to_ptr.hbm [resolvable:$true] %s31_s26 }
   0x3   :  { %15 = vsyncpa [#allocation4], 0  ;;  %s390_s27 = smov [#allocation5]   ;;  %s21_s8 = sshll.u32 %s461_s0, 4  ;;  %s22_s8 = int_to_ptr.hbm [resolvable:$true] %s21_s8 }
   0x4   :  { %s33_s28 = sshll.u32 %s390_s27, 4  ;;  %s391_s9 = smov 128   ;;  %s34_s28 = int_to_ptr.vmem [resolvable:$true] %s33_s28 }
   0x5   :  { %s392_s10 = smov 8   ;;  %s393_s11 = smov [#allocation2]  }
   0x6   :  { %39 = dma.hbm_to_vmem [thread:$0]  %s32_s26, 384, %s34_s28, [#allocation6], %s391_s9, %s391_s9, %s392_s10  }
   0x7   :  { %s23_s12 = sshll.u32 %s393_s11, 4  ;;  %s46_s15 = sshll.u32 %s464_s3, 4  ;;  %s24_s12 = int_to_ptr.vmem [resolvable:$true] %s23_s12  ;;  %s47_s15 = int_to_ptr.hbm [resolvable:$true] %s46_s15 }
   0x8   :  { %26 = dma.hbm_to_vmem [thread:$0]  %s22_s8, 128, %s24_s12, [#allocation3]  }
   0x9   :  { %s61_s17 = sshll.u32 %s466_s5, 4  ;;  %s394_s18 = smov [#allocation7]   ;;  %s62_s17 = int_to_ptr.hbm [resolvable:$true] %s61_s17 }
   0xa   :  { %s48_s19 = sshll.u32 %s394_s18, 4  ;;  %s395_s0 = smov [#allocation8]   ;;  %s49_s19 = int_to_ptr.vmem [resolvable:$true] %s48_s19 }
   0xb   :  { %54 = dma.hbm_to_vmem [thread:$0]  %s47_s15, 2048, %s49_s19, [#allocation6], %s391_s9, %s391_s9, %s392_s10  }
   0xc   :  { %s63_s20 = sshll.u32 %s395_s0, 4  ;;  %s64_s20 = int_to_ptr.vmem [resolvable:$true] %s63_s20 }
   0xd   :  { %69 = dma.hbm_to_vmem [thread:$0]  %s62_s17, 2048, %s64_s20, [#allocation9], %s391_s9, %s391_s9, %s392_s10  }
   0xe   :  { %382 = dma.done.wait [#allocation3], 128  }
   0xf   :  { %383 = vsyncadd [#allocation3], 4294967168 }
  0x10   :  { %384 = dma.done.wait [#allocation6], 2432  }
  0x11   :  { %385 = vsyncadd [#allocation6], 4294964864 }
  0x12   :  { %386 = dma.done.wait [#allocation9], 2048  }
  0x13   :  { %387 = vsyncadd [#allocation9], 4294965248  ;;  %v91_v0 = vld [vmem:[#allocation5 + $0x10] sm:$0xff]  ;;  %v90_v1 = vld [vmem:[#allocation5 + $0x8] sm:$0xff]  ;;  %vm96_vm0 = vcmask 195584   ;;  %v221_v54 = vlaneseq  ;;  %s233_s26 = sshll.u32 %s468_s7, 4  ;;  %s234_s26 = int_to_ptr.hbm [resolvable:$true] %s233_s26 }
  0x14   :  { %113 = vmatpush.msra.mxu0 %v91_v0  ;;  %v136_v2 = vld [vmem:[#allocation7 + $0x78] sm:$0xff]  ;;  %v135_v3 = vld [vmem:[#allocation7 + $0x70] sm:$0xff]  ;;  %v89_v4 = vld [vmem:[#allocation5] sm:$0xff] }
  0x15   :  { %141 = vmatpush.msra.mxu1 %v136_v2  ;;  %v88_v5 = vld [vmem:[#allocation2] sm:$0xff]  ;;  %v134_v6 = vld [vmem:[#allocation7 + $0x68] sm:$0xff]  ;;  %v132_v8 = vld [vmem:[#allocation7 + $0x58] sm:$0xff]  ;;  %v222_v58 = vand.u32 127, %v221_v54 }
  0x16   :  { %114 = vmatpush.msra.mxu0 %v90_v1  ;;  %v133_v7 = vld [vmem:[#allocation7 + $0x60] sm:$0xff]  ;;  %v131_v9 = vld [vmem:[#allocation7 + $0x50] sm:$0xff]  ;;  %v130_v10 = vld [vmem:[#allocation7 + $0x48] sm:$0xff] }
  0x17   :  { %142 = vmatpush.msra.mxu1 %v135_v3  ;;  %v129_v11 = vld [vmem:[#allocation7 + $0x40] sm:$0xff]  ;;  %v128_v12 = vld [vmem:[#allocation7 + $0x38] sm:$0xff]  ;;  %v127_v13 = vld [vmem:[#allocation7 + $0x30] sm:$0xff]  ;;  %vm223_vm2 = vcmp.lt.s32.totalorder %v222_v58, 4 }
  0x18   :  { %115 = vmatpush.msra.mxu0 %v89_v4  ;;  %v126_v14 = vld [vmem:[#allocation7 + $0x28] sm:$0xff]  ;;  %v125_v15 = vld [vmem:[#allocation7 + $0x20] sm:$0xff]  ;;  %v124_v16 = vld [vmem:[#allocation7 + $0x18] sm:$0xff] }
  0x19   :  { %245 = vmatmul.msk.f32.vlgmr.msra.gmra.mxu0 %vm96_vm0, %v88_v5  ;;  %143 = vmatpush.msra.mxu1 %v134_v6  ;;  %v123_v17 = vld [vmem:[#allocation7 + $0x10] sm:$0xff]  ;;  %v122_v18 = vld [vmem:[#allocation7 + $0x8] sm:$0xff]  ;;  %v121_v19 = vld [vmem:[#allocation7] sm:$0xff] }
  0x1a   :  { %v177_v20 = vld [vmem:[#allocation8 + $0x78] sm:$0xff]  ;;  %v176_v21 = vld [vmem:[#allocation8 + $0x70] sm:$0xff]  ;;  %v175_v22 = vld [vmem:[#allocation8 + $0x68] sm:$0xff] }
  0x1b   :  { %144 = vmatpush.msra.mxu1 %v133_v7  ;;  %182 = vmatpush.msra.mxu2 %v177_v20  ;;  %v174_v23 = vld [vmem:[#allocation8 + $0x60] sm:$0xff]  ;;  %v173_v24 = vld [vmem:[#allocation8 + $0x58] sm:$0xff]  ;;  %v172_v25 = vld [vmem:[#allocation8 + $0x50] sm:$0xff] }
  0x1c   :  { %v171_v26 = vld [vmem:[#allocation8 + $0x48] sm:$0xff]  ;;  %v170_v27 = vld [vmem:[#allocation8 + $0x40] sm:$0xff]  ;;  %v169_v28 = vld [vmem:[#allocation8 + $0x38] sm:$0xff] }
  0x1d   :  { %145 = vmatpush.msra.mxu1 %v132_v8  ;;  %183 = vmatpush.msra.mxu2 %v176_v21  ;;  %v168_v29 = vld [vmem:[#allocation8 + $0x30] sm:$0xff]  ;;  %v167_v30 = vld [vmem:[#allocation8 + $0x28] sm:$0xff]  ;;  %v166_v31 = vld [vmem:[#allocation8 + $0x20] sm:$0xff] }
  0x1e   :  { %v165_v32 = vld [vmem:[#allocation8 + $0x18] sm:$0xff]  ;;  %v253_v33 = vld [vmem:[%s463_s2] ss:$0 sm:$0xff]  ;;  %v164_v37 = vld [vmem:[#allocation8 + $0x10] sm:$0xff] }
  0x1f   :  { %146 = vmatpush.msra.mxu1 %v131_v9  ;;  %184 = vmatpush.msra.mxu2 %v175_v22  ;;  %v163_v38 = vld [vmem:[#allocation8 + $0x8] sm:$0xff]  ;;  %v162_v39 = vld [vmem:[#allocation8] sm:$0xff] }
  0x20   :  { %v254_v40 = vld [vmem:[%s465_s4] ss:$0 sm:$0xff]  ;;  %s396_s4 = smov [#allocation10]  }
  0x21   :  { %147 = vmatpush.msra.mxu1 %v130_v10  ;;  %185 = vmatpush.msra.mxu2 %v174_v23  ;;  %v255_v44 = vld [vmem:[%s467_s6] ss:$0 sm:$0xff]  ;;  %s231_s6 = sshll.u32 %s396_s4, 4  ;;  %s232_s6 = int_to_ptr.vmem [resolvable:$true] %s231_s6 }
  0x23   :  { %148 = vmatpush.msra.mxu1 %v129_v11  ;;  %186 = vmatpush.msra.mxu2 %v173_v24 }
  0x25   :  { %149 = vmatpush.msra.mxu1 %v128_v12  ;;  %187 = vmatpush.msra.mxu2 %v172_v25 }
  0x27   :  { %150 = vmatpush.msra.mxu1 %v127_v13  ;;  %188 = vmatpush.msra.mxu2 %v171_v26 }
  0x29   :  { %151 = vmatpush.msra.mxu1 %v126_v14  ;;  %189 = vmatpush.msra.mxu2 %v170_v27 }
  0x2b   :  { %152 = vmatpush.msra.mxu1 %v125_v15  ;;  %190 = vmatpush.msra.mxu2 %v169_v28 }
  0x2d   :  { %153 = vmatpush.msra.mxu1 %v124_v16  ;;  %191 = vmatpush.msra.mxu2 %v168_v29 }
  0x2f   :  { %154 = vmatpush.msra.mxu1 %v123_v17  ;;  %192 = vmatpush.msra.mxu2 %v167_v30 }
  0x31   :  { %155 = vmatpush.msra.mxu1 %v122_v18  ;;  %193 = vmatpush.msra.mxu2 %v166_v31 }
  0x33   :  { %156 = vmatpush.msra.mxu1 %v121_v19  ;;  %194 = vmatpush.msra.mxu2 %v165_v32 }
  0x35   :  { %195 = vmatpush.msra.mxu2 %v164_v37 }
  0x37   :  { %196 = vmatpush.msra.mxu2 %v163_v38 }
  0x39   :  { %197 = vmatpush.msra.mxu2 %v162_v39 }
  0x96   :  { %v117_v34 = vpop.f32.mrf.mxu0 }
  0x97   :  { %v118_v35 = vadd.f32 %v253_v33, %v117_v34 }
  0x99   :  { %v120_v36 = vmax.f32 %v118_v35, 0.0 }
  0x9b   :  { %157 = vmatmul.f32.vlgmr.msra.gmra.mxu1 %v120_v36 }
 0x118   :  { %v158_v41 = vpop.f32.mrf.mxu1 }
 0x119   :  { %v159_v42 = vadd.f32 %v254_v40, %v158_v41 }
 0x11b   :  { %v161_v43 = vmax.f32 %v159_v42, 0.0 }
 0x11d   :  { %198 = vmatmul.f32.vlgmr.msra.gmra.mxu2 %v161_v43 }
 0x1a0   :  { %v199_v45 = vpop.f32.mrf.mxu2 }
 0x1a1   :  { %v200_v46 = vadd.f32 %v255_v44, %v199_v45 }
 0x1a3   :  { %v207_v47 = vand.u32 2147483647, %v200_v46  ;;  %v202_v50 = vmul.f32 0.5, %v200_v46  ;;  %v206_v63 = vmax.f32 %v200_v46, 0.0 }
 0x1a5   :  { %v208_v48 = vsub.f32 0.0, %v207_v47 }
 0x1a7   :  { %v209_v49 = vmul.f32 1.442695, %v208_v48 }
 0x1a9   :  { %256 = vpow2.f32 %v209_v49 }
 0x1aa   :  { %258 = vtanh.f32 %v202_v50 }
 0x1af   :  { %v257_v51 = vpop.eup %256 }
 0x1b0   :  { %v211_v52 = vadd.f32 1.0, %v257_v51  ;;  %v214_v53 = vmul.f32 -0.5, %v257_v51  ;;  %v259_v55 = vpop.eup %258  ;;  %v217_v57 = vand.u32 2147483647, %v257_v51 }
 0x1b1   :  { %v204_v60 = vadd.f32 1.0, %v259_v55 }
 0x1b2   :  { %260 = vlog2.f32 %v211_v52  ;;  %v215_v56 = vadd.f32 1.0, %v214_v53  ;;  %vm218_vm1 = vcmp.lt.f32.partialorder %v217_v57, 0.0004427343 }
 0x1b3   :  { %v205_v1 = vmul.f32 0.5, %v204_v60 }
 0x1b4   :  { %v216_v62 = vmul.f32 %v257_v51, %v215_v56 }
 0x1b8   :  { %v261_v59 = vpop.eup %260 }
 0x1b9   :  { %v213_v61 = vmul.f32 0.6931472, %v261_v59 }
 0x1bb   :  { %v219_v0 = vsel %vm218_vm1, %v216_v62, %v213_v61 }
 0x1bc   :  { %v220_v2 = vadd.f32 %v219_v0, %v206_v63 }
 0x1be   :  { %v224_v3 = vsel %vm223_vm2, %v205_v1, %v220_v2 }
 0x1bf   :  { %225 = vst [vmem:[#allocation10] sm:$0xff] %v224_v3 }
 0x1c0   :  { %236 = dma.vmem_to_hbm [thread:$0]  %s232_s6, 128, %s234_s26, [#allocation4]  }
 0x1c1   :  { %388 = dma.done.wait [#allocation4], 128  }
 0x1c2   :  { %389 = vsyncadd [#allocation4], 4294967168 }
 0x1c3   :  { %241 = vsyncpa [#allocation3], 1 }
 0x1c4   :  { %242 = vsyncpa [#allocation6], 1 }
 0x1c5   :  { %243 = vsyncpa [#allocation9], 1 }
 0x1c6   :  { %244 = vsyncpa [#allocation4], 1 }

</bundles_post_ra>
